<compile_context>
chip_gen: v5e
topology: v5e:2x2
jax: 0.10.0
libtpu: 0.0.40
codegen_flags: <defaults>
</compile_context>

<pallas_src>
import functools

import jax
import jax.numpy as jnp
from jax.experimental import pallas as pl
from jax.experimental.pallas import tpu as pltpu

EPS = 1e-5
NEG_SLOPE = 0.01
LANE = 128


def _pad8(n):
    return ((n + 7) // 8) * 8


def _pad_lane(n):
    return max(LANE, ((n + LANE - 1) // LANE) * LANE)


# ---------------------------------------------------------------------------
# Kernel
# ---------------------------------------------------------------------------
def _reward_fc_kernel(x_ref, u_ref, p_ref, o_ref, *, dims, offs):
    x_size, u_size, H = dims
    B = x_ref.shape[0]
    inv_b = 1.0 / float(B)

    # BN gamma/beta slab, rows: [g1, be1, g2, be2, g3, be3, g4, be4]
    bn = p_ref[offs["bn"]:offs["bn"] + 8, :H]                  # (8, H)

    def bn_lrelu(h, i):
        # training-mode BatchNorm1d: per-feature batch mean + biased variance
        # (two-pass centered form; matches PyTorch and avoids cancellation).
        mean = jnp.sum(h, axis=0, keepdims=True) * inv_b       # (1, H)
        hc = h - mean
        var = jnp.sum(hc * hc, axis=0, keepdims=True) * inv_b  # (1, H)
        scale = bn[2 * i:2 * i + 1, :] * jax.lax.rsqrt(var + EPS)  # EUP slot
        h = hc * scale + bn[2 * i + 1:2 * i + 2, :]
        return jnp.where(h > 0, h, NEG_SLOPE * h)              # LeakyReLU(0.01)

    # layer 1: x@Wx + u@Wu  (== concat([x, u], 1) @ W1^T; Linear bias cancels
    # exactly under training-mode BatchNorm, so it is not in the slab).
    wx = p_ref[offs["wx"]:offs["wx"] + x_size, :H]             # (x_size, H)
    wu = p_ref[offs["wu"]:offs["wu"] + u_size, :H]             # (u_size, H)
    h = (jnp.dot(x_ref[...], wx, preferred_element_type=jnp.float32)
         + jnp.dot(u_ref[...], wu, preferred_element_type=jnp.float32))
    h = bn_lrelu(h, 0)

    # layers 2..4: static 8-aligned sublane slices out of the single slab.
    for i in range(3):
        o = offs["wh%d" % i]
        h = jnp.dot(h, p_ref[o:o + H, :H], preferred_element_type=jnp.float32)
        h = bn_lrelu(h, i + 1)

    # final Linear, lane-padded output -> dense vst (padding sliced off outside)
    w5 = p_ref[offs["w5"]:offs["w5"] + H, :]                   # (H, lane_w)
    b5 = p_ref[offs["b5"]:offs["b5"] + 1, :]                   # (1, lane_w)
    o_ref[...] = (jnp.dot(h, w5, preferred_element_type=jnp.float32)
                  + b5).astype(o_ref.dtype)


# ---------------------------------------------------------------------------
# Parameter construction (PyTorch-shaped) and one-time packing
# ---------------------------------------------------------------------------
def init_params(key, x_size, u_size, y_size, hidden_units):
    """Deterministic synthetic params with the PyTorch module's shapes."""
    d_in = x_size + u_size
    dims = [(d_in, hidden_units)] + [(hidden_units, hidden_units)] * 3 \
           + [(hidden_units, y_size)]
    keys = jax.random.split(key, 2 * len(dims))
    layers = []
    for i, (fan_in, fan_out) in enumerate(dims):
        s = 1.0 / float(fan_in) ** 0.5
        W = jax.random.uniform(keys[2 * i], (fan_out, fan_in), jnp.float32, -s, s)
        b = jax.random.uniform(keys[2 * i + 1], (fan_out,), jnp.float32, -s, s)
        if i < 4:
            g = jnp.ones((fan_out,), jnp.float32)     # BatchNorm1d default affine
            be = jnp.zeros((fan_out,), jnp.float32)
            layers.append((W, b, g, be))
        else:
            layers.append((W, b))
    return layers


def pack_params(layers, x_size, u_size):
    """One-time packing of ALL params into a single (rows, lane_w) f32 slab."""
    (W1, _b1, g1, be1), (W2, _b2, g2, be2), (W3, _b3, g3, be3), \
        (W4, _b4, g4, be4), (W5, b5) = layers
    H = W1.shape[0]
    y_size = W5.shape[0]
    lane_w = _pad_lane(max(H, y_size))

    w1t = W1.T                    # (d_in, H)
    wx = w1t[:x_size]             # (x_size, H)
    wu = w1t[x_size:]             # (u_size, H)

    sections, offs = [], {}
    rows = 0

    def add(name, arr):
        nonlocal rows
        offs[name] = rows
        r = _pad8(arr.shape[0])
        pad = jnp.zeros((r, lane_w), jnp.float32)
        pad = pad.at[:arr.shape[0], :arr.shape[1]].set(arr.astype(jnp.float32))
        sections.append(pad)
        rows += r

    add("wx", wx)                                            # layer 1 (x part)
    add("wu", wu)                                            # layer 1 (u part)
    add("wh0", W2.T)                                         # hidden weights
    add("wh1", W3.T)
    add("wh2", W4.T)
    add("bn", jnp.stack([g1, be1, g2, be2, g3, be3, g4, be4], axis=0))
    add("w5", W5.T)                                          # final weight
    add("b5", b5[None, :])                                   # final bias
    # NOTE: b1..b4 cancel exactly under training-mode BatchNorm -> not packed.

    slab = jnp.concatenate(sections, axis=0)                 # (rows, lane_w)
    return dict(slab=slab, offs=offs, H=H, x_size=x_size, u_size=u_size,
                y_size=y_size, lane_w=lane_w)


# ---------------------------------------------------------------------------
# Wrapper
# ---------------------------------------------------------------------------
def reward_fc_plain(x, u, packed):
    B = x.shape[0]
    H = packed["H"]
    x_size, u_size = packed["x_size"], packed["u_size"]
    y_size, lane_w = packed["y_size"], packed["lane_w"]
    slab = packed["slab"]

    kernel = functools.partial(_reward_fc_kernel,
                               dims=(x_size, u_size, H), offs=packed["offs"])

    # --- VMEM accounting: one consistent number for the gate and the limit ---
    def tile_bytes(r, c):                       # f32 operand padded to (8,128)
        return 4 * _pad8(r) * _pad_lane(c)

    operand_bytes = (tile_bytes(B, x_size) + tile_bytes(B, u_size)
                     + 4 * int(slab.shape[0]) * int(slab.shape[1])   # param slab
                     + tile_bytes(B, lane_w))                        # output
    act_bytes = 4 * 4 * _pad8(B) * _pad_lane(H)  # a few live (B,H) temporaries
    footprint = operand_bytes + act_bytes

    try:  # generation-aware VMEM capacity (v5e/v6e: 128 MiB, v7x: 64 MiB / TC)
        info = pltpu.get_tpu_info()
        vmem_cap = int(getattr(info, "vmem_capacity_bytes", 0)) or 64 * 1024 * 1024
    except Exception:
        vmem_cap = 64 * 1024 * 1024              # conservative v7x per-TC budget
    budget = (3 * vmem_cap) // 4                 # headroom for compiler temps
    assert footprint < budget, (
        "activations+params exceed the whole-batch VMEM budget on this chip; "
        "switch to a batch-tiled two-phase BN (partial sum/sumsq, then "
        "normalize) with dimension_semantics=('parallel',)")
    vmem_limit = int(min(max(4 * footprint, 2 * 1024 * 1024), budget))

    # --- CostEstimate: matmul flops (unpadded y), all real bytes touched ------
    flops = 2 * B * (x_size * H + u_size * H + 3 * H * H + H * y_size)
    bytes_accessed = 4 * (B * x_size + B * u_size + int(slab.size) + B * lane_w)
    transcendentals = 4 * H                      # one rsqrt per BN feature/layer

    out = pl.pallas_call(
        kernel,
        out_shape=jax.ShapeDtypeStruct((B, lane_w), jnp.float32),
        in_specs=[pl.BlockSpec(memory_space=pltpu.MemorySpace.VMEM)] * 3,
        out_specs=pl.BlockSpec(memory_space=pltpu.MemorySpace.VMEM),
        compiler_params=pltpu.CompilerParams(vmem_limit_bytes=vmem_limit),
        cost_estimate=pl.CostEstimate(flops=flops,
                                      transcendentals=transcendentals,
                                      bytes_accessed=bytes_accessed),
    )(x, u, slab)
    return out[:, :y_size]


# ---------------------------------------------------------------------------
# Pure-JAX reference (PyTorch training-mode forward, unpacked params)
# ---------------------------------------------------------------------------
def reward_fc_reference(x, u, layers):
    h = jnp.concatenate([x, u], axis=1)
    for i in range(4):
        W, b, g, be = layers[i]
        h = h @ W.T + b
        mean = jnp.mean(h, axis=0, keepdims=True)
        var = jnp.mean((h - mean) ** 2, axis=0, keepdims=True)
        h = (h - mean) / jnp.sqrt(var + EPS) * g + be
        h = jnp.where(h > 0, h, NEG_SLOPE * h)
    W5, b5 = layers[4]
    return h @ W5.T + b5


if __name__ == "__main__":
    # Small shapes consistent with the module's forward.  NOTE: wall time here
    # is dominated by the fixed ~1-2 us pallas_call + DMA cost; extra batch
    # rows (up to ~128-256) are essentially free, so callers should grow/stack
    # the batch to amortize the launch overhead when possible.
    batch = 8
    x_size, u_size, y_size, hidden_units = 12, 4, 3, 32

    key = jax.random.PRNGKey(0)
    kx, ku, kp = jax.random.split(key, 3)
    x = jax.random.normal(kx, (batch, x_size), jnp.float32)
    u = jax.random.normal(ku, (batch, u_size), jnp.float32)

    layers = init_params(kp, x_size, u_size, y_size, hidden_units)
    packed = pack_params(layers, x_size, u_size)

    y = reward_fc_plain(x, u, packed)
    y = jax.block_until_ready(y)

    y_ref = reward_fc_reference(x, u, layers)
    assert y.shape == (batch, y_size)
    assert jnp.allclose(y, y_ref, atol=1e-4, rtol=1e-4), "mismatch vs reference"
    print("KERNEL_OK")
</pallas_src>

<mosaic_0001>
module attributes {stable_mosaic.version = 11 : i64} {
  func.func @_reward_fc_kernel(%arg0: memref<8x12xf32, #tpu.memory_space<vmem>>, %arg1: memref<8x4xf32, #tpu.memory_space<vmem>>, %arg2: memref<168x128xf32, #tpu.memory_space<vmem>>, %arg3: memref<8x128xf32, #tpu.memory_space<vmem>>) attributes {dimension_semantics = [], scalar_prefetch = 0 : i64, scratch_operands = 0 : i64, tpu.core_type = #tpu.core_type<tc>} {
    %c120 = arith.constant 120 : index
    %c0 = arith.constant 0 : index
    %0 = vector.load %arg2[%c120, %c0] : memref<168x128xf32, #tpu.memory_space<vmem>>, vector<8x32xf32>
    %c0_0 = arith.constant 0 : index
    %c0_1 = arith.constant 0 : index
    %1 = vector.load %arg2[%c0_0, %c0_1] : memref<168x128xf32, #tpu.memory_space<vmem>>, vector<12x32xf32>
    %c16 = arith.constant 16 : index
    %c0_2 = arith.constant 0 : index
    %2 = vector.load %arg2[%c16, %c0_2] : memref<168x128xf32, #tpu.memory_space<vmem>>, vector<4x32xf32>
    %c0_3 = arith.constant 0 : index
    %c0_4 = arith.constant 0 : index
    %3 = vector.load %arg0[%c0_3, %c0_4] : memref<8x12xf32, #tpu.memory_space<vmem>>, vector<8x12xf32>
    %cst = arith.constant dense<0.000000e+00> : vector<8x32xf32>
    %4 = tpu.matmul %3, %1, %cst {dimension_numbers = #tpu.dot_dimension_numbers<[1], [0], [0], [1], [0, 0, 1, 1], [], []>} : vector<8x12xf32>, vector<12x32xf32>, vector<8x32xf32> -> vector<8x32xf32>
    %c0_5 = arith.constant 0 : index
    %c0_6 = arith.constant 0 : index
    %5 = vector.load %arg1[%c0_5, %c0_6] : memref<8x4xf32, #tpu.memory_space<vmem>>, vector<8x4xf32>
    %cst_7 = arith.constant dense<0.000000e+00> : vector<8x32xf32>
    %6 = tpu.matmul %5, %2, %cst_7 {dimension_numbers = #tpu.dot_dimension_numbers<[1], [0], [0], [1], [0, 0, 1, 1], [], []>} : vector<8x4xf32>, vector<4x32xf32>, vector<8x32xf32> -> vector<8x32xf32>
    %7 = arith.addf %4, %6 : vector<8x32xf32>
    %cst_8 = arith.constant dense<0.000000e+00> : vector<32xf32>
    %8 = vector.multi_reduction <add>, %7, %cst_8 [0] : vector<8x32xf32> to vector<32xf32>
    %9 = vector.shape_cast %8 : vector<32xf32> to vector<1x32xf32>
    %cst_9 = arith.constant 1.250000e-01 : f32
    %10 = vector.broadcast %cst_9 : f32 to vector<1x32xf32>
    %11 = arith.mulf %9, %10 : vector<1x32xf32>
    %12 = vector.broadcast %11 : vector<1x32xf32> to vector<8x32xf32>
    %13 = arith.subf %7, %12 : vector<8x32xf32>
    %14 = arith.mulf %13, %13 : vector<8x32xf32>
    %cst_10 = arith.constant dense<0.000000e+00> : vector<32xf32>
    %15 = vector.multi_reduction <add>, %14, %cst_10 [0] : vector<8x32xf32> to vector<32xf32>
    %16 = vector.shape_cast %15 : vector<32xf32> to vector<1x32xf32>
    %cst_11 = arith.constant 1.250000e-01 : f32
    %17 = vector.broadcast %cst_11 : f32 to vector<1x32xf32>
    %18 = arith.mulf %16, %17 : vector<1x32xf32>
    %19 = vector.extract_strided_slice %0 {offsets = [0, 0], sizes = [1, 32], strides = [1, 1]} : vector<8x32xf32> to vector<1x32xf32>
    %cst_12 = arith.constant 9.99999974E-6 : f32
    %20 = vector.broadcast %cst_12 : f32 to vector<1x32xf32>
    %21 = arith.addf %18, %20 : vector<1x32xf32>
    %22 = math.rsqrt %21 : vector<1x32xf32>
    %23 = arith.mulf %19, %22 : vector<1x32xf32>
    %24 = vector.broadcast %23 : vector<1x32xf32> to vector<8x32xf32>
    %25 = arith.mulf %13, %24 : vector<8x32xf32>
    %26 = vector.extract_strided_slice %0 {offsets = [1, 0], sizes = [1, 32], strides = [1, 1]} : vector<8x32xf32> to vector<1x32xf32>
    %27 = vector.broadcast %26 : vector<1x32xf32> to vector<8x32xf32>
    %28 = arith.addf %25, %27 : vector<8x32xf32>
    %cst_13 = arith.constant 0.000000e+00 : f32
    %29 = vector.broadcast %cst_13 : f32 to vector<8x32xf32>
    %30 = arith.cmpf ogt, %28, %29 : vector<8x32xf32>
    %cst_14 = arith.constant 0.00999999977 : f32
    %31 = vector.broadcast %cst_14 : f32 to vector<8x32xf32>
    %32 = arith.mulf %31, %28 : vector<8x32xf32>
    %33 = arith.select %30, %28, %32 : vector<8x32xi1>, vector<8x32xf32>
    %c24 = arith.constant 24 : index
    %c0_15 = arith.constant 0 : index
    %34 = vector.load %arg2[%c24, %c0_15] : memref<168x128xf32, #tpu.memory_space<vmem>>, vector<32x32xf32>
    %cst_16 = arith.constant dense<0.000000e+00> : vector<8x32xf32>
    %35 = tpu.matmul %33, %34, %cst_16 {dimension_numbers = #tpu.dot_dimension_numbers<[1], [0], [0], [1], [0, 0, 1, 1], [], []>} : vector<8x32xf32>, vector<32x32xf32>, vector<8x32xf32> -> vector<8x32xf32>
    %cst_17 = arith.constant dense<0.000000e+00> : vector<32xf32>
    %36 = vector.multi_reduction <add>, %35, %cst_17 [0] : vector<8x32xf32> to vector<32xf32>
    %37 = vector.shape_cast %36 : vector<32xf32> to vector<1x32xf32>
    %cst_18 = arith.constant 1.250000e-01 : f32
    %38 = vector.broadcast %cst_18 : f32 to vector<1x32xf32>
    %39 = arith.mulf %37, %38 : vector<1x32xf32>
    %40 = vector.broadcast %39 : vector<1x32xf32> to vector<8x32xf32>
    %41 = arith.subf %35, %40 : vector<8x32xf32>
    %42 = arith.mulf %41, %41 : vector<8x32xf32>
    %cst_19 = arith.constant dense<0.000000e+00> : vector<32xf32>
    %43 = vector.multi_reduction <add>, %42, %cst_19 [0] : vector<8x32xf32> to vector<32xf32>
    %44 = vector.shape_cast %43 : vector<32xf32> to vector<1x32xf32>
    %cst_20 = arith.constant 1.250000e-01 : f32
    %45 = vector.broadcast %cst_20 : f32 to vector<1x32xf32>
    %46 = arith.mulf %44, %45 : vector<1x32xf32>
    %47 = vector.extract_strided_slice %0 {offsets = [2, 0], sizes = [1, 32], strides = [1, 1]} : vector<8x32xf32> to vector<1x32xf32>
    %cst_21 = arith.constant 9.99999974E-6 : f32
    %48 = vector.broadcast %cst_21 : f32 to vector<1x32xf32>
    %49 = arith.addf %46, %48 : vector<1x32xf32>
    %50 = math.rsqrt %49 : vector<1x32xf32>
    %51 = arith.mulf %47, %50 : vector<1x32xf32>
    %52 = vector.broadcast %51 : vector<1x32xf32> to vector<8x32xf32>
    %53 = arith.mulf %41, %52 : vector<8x32xf32>
    %54 = vector.extract_strided_slice %0 {offsets = [3, 0], sizes = [1, 32], strides = [1, 1]} : vector<8x32xf32> to vector<1x32xf32>
    %55 = vector.broadcast %54 : vector<1x32xf32> to vector<8x32xf32>
    %56 = arith.addf %53, %55 : vector<8x32xf32>
    %cst_22 = arith.constant 0.000000e+00 : f32
    %57 = vector.broadcast %cst_22 : f32 to vector<8x32xf32>
    %58 = arith.cmpf ogt, %56, %57 : vector<8x32xf32>
    %cst_23 = arith.constant 0.00999999977 : f32
    %59 = vector.broadcast %cst_23 : f32 to vector<8x32xf32>
    %60 = arith.mulf %59, %56 : vector<8x32xf32>
    %61 = arith.select %58, %56, %60 : vector<8x32xi1>, vector<8x32xf32>
    %c56 = arith.constant 56 : index
    %c0_24 = arith.constant 0 : index
    %62 = vector.load %arg2[%c56, %c0_24] : memref<168x128xf32, #tpu.memory_space<vmem>>, vector<32x32xf32>
    %cst_25 = arith.constant dense<0.000000e+00> : vector<8x32xf32>
    %63 = tpu.matmul %61, %62, %cst_25 {dimension_numbers = #tpu.dot_dimension_numbers<[1], [0], [0], [1], [0, 0, 1, 1], [], []>} : vector<8x32xf32>, vector<32x32xf32>, vector<8x32xf32> -> vector<8x32xf32>
    %cst_26 = arith.constant dense<0.000000e+00> : vector<32xf32>
    %64 = vector.multi_reduction <add>, %63, %cst_26 [0] : vector<8x32xf32> to vector<32xf32>
    %65 = vector.shape_cast %64 : vector<32xf32> to vector<1x32xf32>
    %cst_27 = arith.constant 1.250000e-01 : f32
    %66 = vector.broadcast %cst_27 : f32 to vector<1x32xf32>
    %67 = arith.mulf %65, %66 : vector<1x32xf32>
    %68 = vector.broadcast %67 : vector<1x32xf32> to vector<8x32xf32>
    %69 = arith.subf %63, %68 : vector<8x32xf32>
    %70 = arith.mulf %69, %69 : vector<8x32xf32>
    %cst_28 = arith.constant dense<0.000000e+00> : vector<32xf32>
    %71 = vector.multi_reduction <add>, %70, %cst_28 [0] : vector<8x32xf32> to vector<32xf32>
    %72 = vector.shape_cast %71 : vector<32xf32> to vector<1x32xf32>
    %cst_29 = arith.constant 1.250000e-01 : f32
    %73 = vector.broadcast %cst_29 : f32 to vector<1x32xf32>
    %74 = arith.mulf %72, %73 : vector<1x32xf32>
    %75 = vector.extract_strided_slice %0 {offsets = [4, 0], sizes = [1, 32], strides = [1, 1]} : vector<8x32xf32> to vector<1x32xf32>
    %cst_30 = arith.constant 9.99999974E-6 : f32
    %76 = vector.broadcast %cst_30 : f32 to vector<1x32xf32>
    %77 = arith.addf %74, %76 : vector<1x32xf32>
    %78 = math.rsqrt %77 : vector<1x32xf32>
    %79 = arith.mulf %75, %78 : vector<1x32xf32>
    %80 = vector.broadcast %79 : vector<1x32xf32> to vector<8x32xf32>
    %81 = arith.mulf %69, %80 : vector<8x32xf32>
    %82 = vector.extract_strided_slice %0 {offsets = [5, 0], sizes = [1, 32], strides = [1, 1]} : vector<8x32xf32> to vector<1x32xf32>
    %83 = vector.broadcast %82 : vector<1x32xf32> to vector<8x32xf32>
    %84 = arith.addf %81, %83 : vector<8x32xf32>
    %cst_31 = arith.constant 0.000000e+00 : f32
    %85 = vector.broadcast %cst_31 : f32 to vector<8x32xf32>
    %86 = arith.cmpf ogt, %84, %85 : vector<8x32xf32>
    %cst_32 = arith.constant 0.00999999977 : f32
    %87 = vector.broadcast %cst_32 : f32 to vector<8x32xf32>
    %88 = arith.mulf %87, %84 : vector<8x32xf32>
    %89 = arith.select %86, %84, %88 : vector<8x32xi1>, vector<8x32xf32>
    %c88 = arith.constant 88 : index
    %c0_33 = arith.constant 0 : index
    %90 = vector.load %arg2[%c88, %c0_33] : memref<168x128xf32, #tpu.memory_space<vmem>>, vector<32x32xf32>
    %cst_34 = arith.constant dense<0.000000e+00> : vector<8x32xf32>
    %91 = tpu.matmul %89, %90, %cst_34 {dimension_numbers = #tpu.dot_dimension_numbers<[1], [0], [0], [1], [0, 0, 1, 1], [], []>} : vector<8x32xf32>, vector<32x32xf32>, vector<8x32xf32> -> vector<8x32xf32>
    %cst_35 = arith.constant dense<0.000000e+00> : vector<32xf32>
    %92 = vector.multi_reduction <add>, %91, %cst_35 [0] : vector<8x32xf32> to vector<32xf32>
    %93 = vector.shape_cast %92 : vector<32xf32> to vector<1x32xf32>
    %cst_36 = arith.constant 1.250000e-01 : f32
    %94 = vector.broadcast %cst_36 : f32 to vector<1x32xf32>
    %95 = arith.mulf %93, %94 : vector<1x32xf32>
    %96 = vector.broadcast %95 : vector<1x32xf32> to vector<8x32xf32>
    %97 = arith.subf %91, %96 : vector<8x32xf32>
    %98 = arith.mulf %97, %97 : vector<8x32xf32>
    %cst_37 = arith.constant dense<0.000000e+00> : vector<32xf32>
    %99 = vector.multi_reduction <add>, %98, %cst_37 [0] : vector<8x32xf32> to vector<32xf32>
    %100 = vector.shape_cast %99 : vector<32xf32> to vector<1x32xf32>
    %cst_38 = arith.constant 1.250000e-01 : f32
    %101 = vector.broadcast %cst_38 : f32 to vector<1x32xf32>
    %102 = arith.mulf %100, %101 : vector<1x32xf32>
    %103 = vector.extract_strided_slice %0 {offsets = [6, 0], sizes = [1, 32], strides = [1, 1]} : vector<8x32xf32> to vector<1x32xf32>
    %cst_39 = arith.constant 9.99999974E-6 : f32
    %104 = vector.broadcast %cst_39 : f32 to vector<1x32xf32>
    %105 = arith.addf %102, %104 : vector<1x32xf32>
    %106 = math.rsqrt %105 : vector<1x32xf32>
    %107 = arith.mulf %103, %106 : vector<1x32xf32>
    %108 = vector.broadcast %107 : vector<1x32xf32> to vector<8x32xf32>
    %109 = arith.mulf %97, %108 : vector<8x32xf32>
    %110 = vector.extract_strided_slice %0 {offsets = [7, 0], sizes = [1, 32], strides = [1, 1]} : vector<8x32xf32> to vector<1x32xf32>
    %111 = vector.broadcast %110 : vector<1x32xf32> to vector<8x32xf32>
    %112 = arith.addf %109, %111 : vector<8x32xf32>
    %cst_40 = arith.constant 0.000000e+00 : f32
    %113 = vector.broadcast %cst_40 : f32 to vector<8x32xf32>
    %114 = arith.cmpf ogt, %112, %113 : vector<8x32xf32>
    %cst_41 = arith.constant 0.00999999977 : f32
    %115 = vector.broadcast %cst_41 : f32 to vector<8x32xf32>
    %116 = arith.mulf %115, %112 : vector<8x32xf32>
    %117 = arith.select %114, %112, %116 : vector<8x32xi1>, vector<8x32xf32>
    %c128 = arith.constant 128 : index
    %c0_42 = arith.constant 0 : index
    %118 = vector.load %arg2[%c128, %c0_42] : memref<168x128xf32, #tpu.memory_space<vmem>>, vector<32x128xf32>
    %c160 = arith.constant 160 : index
    %c0_43 = arith.constant 0 : index
    %119 = vector.load %arg2[%c160, %c0_43] : memref<168x128xf32, #tpu.memory_space<vmem>>, vector<1x128xf32>
    %cst_44 = arith.constant dense<0.000000e+00> : vector<8x128xf32>
    %120 = tpu.matmul %117, %118, %cst_44 {dimension_numbers = #tpu.dot_dimension_numbers<[1], [0], [0], [1], [0, 0, 1, 1], [], []>} : vector<8x32xf32>, vector<32x128xf32>, vector<8x128xf32> -> vector<8x128xf32>
    %121 = vector.broadcast %119 : vector<1x128xf32> to vector<8x128xf32>
    %122 = arith.addf %120, %121 : vector<8x128xf32>
    %c0_45 = arith.constant 0 : index
    %c0_46 = arith.constant 0 : index
    %123 = vector.load %arg3[%c0_45, %c0_46] : memref<8x128xf32, #tpu.memory_space<vmem>>, vector<8x128xf32>
    tpu.vector_store %arg3[%c0_45, %c0_46], %122 {strides = array<i32>} : memref<8x128xf32, #tpu.memory_space<vmem>>, vector<8x128xf32>,
    return
  }
}

</mosaic_0001>

<bundles_post_ra>
// kernel: tpu_custom_call.1
= control target key start
LH: loop header
LB: loop body
LE: loop exit
PB: predicated region body
PF: predicated region fallthrough
CT: control target
= control target key end

     0   :  { %8 = vsyncpa [#allocation3], 0  ;;  %s500_s0 = inlined_call_operand.vmem [shape: f32[8,12], index: 0, kind: input, shape index: {}]   ;;  %s501_s1 = inlined_call_operand.vmem [shape: f32[8,4], index: 1, kind: input, shape index: {}]   ;;  %s502_s2 = inlined_call_operand.hbm [shape: f32[168,128], index: 2, kind: input, shape index: {}]   ;;  %s503_s3 = inlined_call_operand.hbm [shape: f32[8,128], index: 3, kind: output, shape index: {}]  }
   0x1   :  { %9 = vsyncpa [#allocation4], 0  ;;  %s18_s14 = sshll.u32 %s502_s2, 4  ;;  %s442_s15 = smov [#allocation2]   ;;  %s19_s14 = int_to_ptr.hbm [resolvable:$true] %s18_s14 }
   0x2   :  { %s20_s16 = sshll.u32 %s442_s15, 4  ;;  %s443_s17 = smov 128   ;;  %s21_s16 = int_to_ptr.vmem [resolvable:$true] %s20_s16 }
   0x3   :  { %s444_s18 = smov 8  }
   0x4   :  { %26 = dma.hbm_to_vmem [thread:$0]  %s19_s14, 2688, %s21_s16, [#allocation3], %s443_s17, %s443_s17, %s444_s18  }
   0x5   :  { %438 = dma.done.wait [#allocation3], 2688  }
   0x6   :  { %439 = vsyncadd [#allocation3], 4294964608  ;;  %vm41_vm0 = vcmask 1043456   ;;  %vm37_vm1 = vcmask 31744   ;;  %v33_v0 = vld [vmem:[#allocation2 + $0x8] sm:$0xf] }
   0x7   :  { %v34_v1 = vld [vmem:[#allocation2 + $0x10] sm:$0xf]  ;;  %v32_v2 = vld [vmem:[#allocation2] sm:$0xff]  ;;  %371 = vmatpush.msk.msra.mxu1 %vm41_vm0, %v33_v0  ;;  %vm65_vm2 = vcmask 97280   ;;  %vm92_vm3 = vcmask 261120   ;;  %v132_v24 = vld [vmem:[#allocation2 + $0x28] sm:$0xff] }
   0x8   :  { %369 = vmatpush.msk.msra.mxu0 %vm41_vm0, %v34_v1  ;;  %v36_v3 = vld [vmem:[%s501_s1] sm:$0xff]  ;;  %v133_v22 = vld [vmem:[#allocation2 + $0x30] sm:$0xff]  ;;  %v130_v27 = vld [vmem:[#allocation2 + $0x18] sm:$0xff]  ;;  %s359_s24 = sshll.u32 %s503_s3, 4  ;;  %s360_s24 = int_to_ptr.hbm [resolvable:$true] %s359_s24 }
   0x9   :  { %v35_v4 = vld [vmem:[%s500_s0] sm:$0xff]  ;;  %370 = vmatmul.msk.f32.vlgmr.msra.gmra.mxu0 %vm37_vm1, %v36_v3  ;;  %87 = vmatpush.msra.mxu1 %v32_v2  ;;  %v477_v36 = vld [vmem:[#allocation2 + $0x78] sm:$0xff]  ;;  %v197_v61 = vld [vmem:[#allocation2 + $0x50] sm:$0xff]  ;;  %s445_s0 = smov [#allocation5]  }
   0xa   :  { %372 = vmatmul.msk.f32.vlgmr.msra.gmra.mxu1 %vm65_vm2, %v35_v4  ;;  %149 = vmatpush.msra.mxu2 %v133_v22  ;;  %v131_v25 = vld [vmem:[#allocation2 + $0x20] sm:$0xff]  ;;  %v125_v41 = vperm.slane %v477_v36, 1  ;;  %v196_v63 = vld [vmem:[#allocation2 + $0x48] sm:$0xff]  ;;  %v194_v2 = vld [vmem:[#allocation2 + $0x38] sm:$0xff]  ;;  %s357_s1 = sshll.u32 %s445_s0, 4  ;;  %s358_s1 = int_to_ptr.vmem [resolvable:$true] %s357_s1 }
   0xb   :  { %213 = vmatpush.msra.mxu3 %v197_v61  ;;  %v195_v1 = vld [vmem:[#allocation2 + $0x40] sm:$0xff] }
   0xc   :  { %150 = vmatpush.msra.mxu2 %v132_v24 }
   0xd   :  { %214 = vmatpush.msra.mxu3 %v196_v63 }
   0xe   :  { %151 = vmatpush.msra.mxu2 %v131_v25 }
   0xf   :  { %215 = vmatpush.msra.mxu3 %v195_v1 }
  0x10   :  { %152 = vmatpush.msra.mxu2 %v130_v27 }
  0x11   :  { %216 = vmatpush.msra.mxu3 %v194_v2 }
  0x86   :  { %v62_v5 = vpop.f32.mrf.mxu0 }
  0x87   :  { %v89_v6 = vpop.f32.mrf.mxu1 }
  0x88   :  { %v90_v7 = vadd.f32 %v89_v6, %v62_v5 }
  0x8a   :  { %v93_v8 = vsel %vm92_vm3, %v90_v7, 0.0 }
  0x8b   :  { %v94_v9 = vrot.slane %v93_v8, 4 }
  0x8d   :  { %v95_v10 = vadd.f32 %v94_v9, %v93_v8 }
  0x8f   :  { %v96_v11 = vrot.slane %v95_v10, 2 }
  0x91   :  { %v97_v12 = vadd.f32 %v96_v11, %v95_v10 }
  0x93   :  { %v98_v13 = vrot.slane %v97_v12, 1 }
  0x95   :  { %v99_v14 = vadd.f32 %v98_v13, %v97_v12 }
  0x97   :  { %v100_v15 = vmul.f32 0.125, %v99_v14 }
  0x99   :  { %v101_v16 = vsub.f32 %v90_v7, %v100_v15  ;;  %v189_v15 = vperm.slane %v477_v36, 3 }
  0x9b   :  { %v102_v17 = vmul.f32 %v101_v16, %v101_v16 }
  0x9d   :  { %v103_v18 = vsel %vm92_vm3, %v102_v17, 0.0 }
  0x9e   :  { %v104_v19 = vrot.slane %v103_v18, 4 }
  0xa0   :  { %v105_v20 = vadd.f32 %v104_v19, %v103_v18 }
  0xa2   :  { %v106_v21 = vrot.slane %v105_v20, 2 }
  0xa4   :  { %v107_v23 = vadd.f32 %v106_v21, %v105_v20 }
  0xa6   :  { %v108_v26 = vrot.slane %v107_v23, 1 }
  0xa8   :  { %v109_v28 = vadd.f32 %v108_v26, %v107_v23 }
  0xaa   :  { %v110_v29 = vmul.f32 0.125, %v109_v28 }
  0xac   :  { %v111_v30 = vadd.f32 1e-05, %v110_v29 }
  0xae   :  { %382 = vrsqrt.f32 %v111_v30  ;;  %vm118_vm5 = vweird.f32 %v111_v30 }
  0xb4   :  { %v383_v31 = vpop.eup %382 }
  0xb5   :  { %v113_v32 = vmul.f32 %v383_v31, %v111_v30  ;;  %vm119_vm4 = vweird.f32 %v383_v31 }
  0xb6   :  { %vm120_vm6 = vmor %vm118_vm5, %vm119_vm4 }
  0xb7   :  { %v114_v33 = vmul.f32 %v383_v31, %v113_v32 }
  0xb9   :  { %v115_v34 = vmul.f32 0.5, %v114_v33 }
  0xbb   :  { %v116_v35 = vsub.f32 1.5, %v115_v34 }
  0xbd   :  { %v117_v37 = vmul.f32 %v383_v31, %v116_v35  ;;  %v261_v35 = vld [vmem:[#allocation2 + $0x70] sm:$0xff] }
  0xbe   :  { %277 = vmatpush.msrb.mxu0 %v261_v35 }
  0xbf   :  { %v121_v38 = vsel %vm120_vm6, %v383_v31, %v117_v37 }
  0xc0   :  { %v122_v39 = vmul.f32 %v121_v38, %v477_v36  ;;  %v260_v38 = vld [vmem:[#allocation2 + $0x68] sm:$0xff] }
  0xc1   :  { %278 = vmatpush.msrb.mxu0 %v260_v38 }
  0xc2   :  { %v123_v40 = vperm.slane %v122_v39, 0 }
  0xc4   :  { %v124_v42 = vmul.f32 %v123_v40, %v101_v16  ;;  %v259_v40 = vld [vmem:[#allocation2 + $0x60] sm:$0xff] }
  0xc5   :  { %279 = vmatpush.msrb.mxu0 %v259_v40 }
  0xc6   :  { %v126_v43 = vadd.f32 %v125_v41, %v124_v42  ;;  %v258_v41 = vld [vmem:[#allocation2 + $0x58] sm:$0xff] }
  0xc7   :  { %280 = vmatpush.msrb.mxu0 %v258_v41 }
  0xc8   :  { %vm127_vm7 = vcmp.gt.f32.partialorder %v126_v43, 0.0  ;;  %v128_v44 = vmul.f32 0.01, %v126_v43 }
  0xca   :  { %v129_v45 = vsel %vm127_vm7, %v126_v43, %v128_v44 }
  0xcb   :  { %373 = vmatmul.msk.f32.vlgmr.msra.gmra.mxu2 %vm92_vm3, %v129_v45 }
 0x14e   :  { %v154_v46 = vpop.f32.mrf.mxu2 }
 0x14f   :  { %v157_v47 = vsel %vm92_vm3, %v154_v46, 0.0 }
 0x150   :  { %v158_v48 = vrot.slane %v157_v47, 4 }
 0x152   :  { %v159_v49 = vadd.f32 %v158_v48, %v157_v47 }
 0x154   :  { %v160_v50 = vrot.slane %v159_v49, 2 }
 0x156   :  { %v161_v51 = vadd.f32 %v160_v50, %v159_v49 }
 0x158   :  { %v162_v52 = vrot.slane %v161_v51, 1 }
 0x15a   :  { %v163_v53 = vadd.f32 %v162_v52, %v161_v51 }
 0x15c   :  { %v164_v54 = vmul.f32 0.125, %v163_v53 }
 0x15e   :  { %v165_v55 = vsub.f32 %v154_v46, %v164_v54  ;;  %v253_v54 = vperm.slane %v477_v36, 5 }
 0x160   :  { %v166_v56 = vmul.f32 %v165_v55, %v165_v55 }
 0x162   :  { %v167_v57 = vsel %vm92_vm3, %v166_v56, 0.0 }
 0x163   :  { %v168_v58 = vrot.slane %v167_v57, 4 }
 0x165   :  { %v169_v59 = vadd.f32 %v168_v58, %v167_v57 }
 0x167   :  { %v170_v60 = vrot.slane %v169_v59, 2 }
 0x169   :  { %v171_v62 = vadd.f32 %v170_v60, %v169_v59 }
 0x16b   :  { %v172_v0 = vrot.slane %v171_v62, 1 }
 0x16d   :  { %v173_v3 = vadd.f32 %v172_v0, %v171_v62 }
 0x16f   :  { %v174_v4 = vmul.f32 0.125, %v173_v3 }
 0x171   :  { %v175_v5 = vadd.f32 1e-05, %v174_v4 }
 0x173   :  { %384 = vrsqrt.f32 %v175_v5  ;;  %vm182_vm9 = vweird.f32 %v175_v5 }
 0x179   :  { %v385_v6 = vpop.eup %384 }
 0x17a   :  { %v177_v7 = vmul.f32 %v385_v6, %v175_v5  ;;  %vm183_vm8 = vweird.f32 %v385_v6 }
 0x17b   :  { %vm184_vm10 = vmor %vm182_vm9, %vm183_vm8 }
 0x17c   :  { %v178_v8 = vmul.f32 %v385_v6, %v177_v7 }
 0x17e   :  { %v179_v9 = vmul.f32 0.5, %v178_v8 }
 0x180   :  { %v180_v10 = vsub.f32 1.5, %v179_v9 }
 0x182   :  { %v181_v11 = vmul.f32 %v385_v6, %v180_v10  ;;  %v325_v10 = vld [vmem:[#allocation2 + $0x98] sm:$0xff] }
 0x183   :  { %343 = vmatpush.msrb.mxu1 %v325_v10 }
 0x184   :  { %v185_v12 = vsel %vm184_vm10, %v385_v6, %v181_v11 }
 0x185   :  { %v186_v13 = vmul.f32 %v185_v12, %v477_v36  ;;  %v324_v12 = vld [vmem:[#allocation2 + $0x90] sm:$0xff] }
 0x186   :  { %344 = vmatpush.msrb.mxu1 %v324_v12 }
 0x187   :  { %v187_v14 = vperm.slane %v186_v13, 2 }
 0x189   :  { %v188_v16 = vmul.f32 %v187_v14, %v165_v55  ;;  %v323_v14 = vld [vmem:[#allocation2 + $0x88] sm:$0xff] }
 0x18a   :  { %345 = vmatpush.msrb.mxu1 %v323_v14 }
 0x18b   :  { %v190_v17 = vadd.f32 %v189_v15, %v188_v16  ;;  %v322_v15 = vld [vmem:[#allocation2 + $0x80] sm:$0xff] }
 0x18c   :  { %346 = vmatpush.msrb.mxu1 %v322_v15 }
 0x18d   :  { %vm191_vm11 = vcmp.gt.f32.partialorder %v190_v17, 0.0  ;;  %v192_v18 = vmul.f32 0.01, %v190_v17 }
 0x18f   :  { %v193_v19 = vsel %vm191_vm11, %v190_v17, %v192_v18 }
 0x190   :  { %374 = vmatmul.msk.f32.vlgmr.msra.gmra.mxu3 %vm92_vm3, %v193_v19 }
 0x213   :  { %v218_v20 = vpop.f32.mrf.mxu3 }
 0x214   :  { %v221_v21 = vsel %vm92_vm3, %v218_v20, 0.0 }
 0x215   :  { %v222_v22 = vrot.slane %v221_v21, 4 }
 0x217   :  { %v223_v23 = vadd.f32 %v222_v22, %v221_v21 }
 0x219   :  { %v224_v24 = vrot.slane %v223_v23, 2 }
 0x21b   :  { %v225_v25 = vadd.f32 %v224_v24, %v223_v23 }
 0x21d   :  { %v226_v26 = vrot.slane %v225_v25, 1 }
 0x21f   :  { %v227_v27 = vadd.f32 %v226_v26, %v225_v25 }
 0x221   :  { %v228_v28 = vmul.f32 0.125, %v227_v27 }
 0x223   :  { %v229_v29 = vsub.f32 %v218_v20, %v228_v28  ;;  %v317_v28 = vperm.slane %v477_v36, 7 }
 0x225   :  { %v230_v30 = vmul.f32 %v229_v29, %v229_v29 }
 0x227   :  { %v231_v31 = vsel %vm92_vm3, %v230_v30, 0.0 }
 0x228   :  { %v232_v32 = vrot.slane %v231_v31, 4 }
 0x22a   :  { %v233_v33 = vadd.f32 %v232_v32, %v231_v31 }
 0x22c   :  { %v234_v34 = vrot.slane %v233_v33, 2 }
 0x22e   :  { %v235_v37 = vadd.f32 %v234_v34, %v233_v33  ;;  %v381_v33 = vld [vmem:[#allocation2 + $0xa0] ss:$0 sm:$0xff] }
 0x230   :  { %v236_v39 = vrot.slane %v235_v37, 1 }
 0x232   :  { %v237_v42 = vadd.f32 %v236_v39, %v235_v37 }
 0x234   :  { %v238_v43 = vmul.f32 0.125, %v237_v42 }
 0x236   :  { %v239_v44 = vadd.f32 1e-05, %v238_v43 }
 0x238   :  { %386 = vrsqrt.f32 %v239_v44  ;;  %vm246_vm13 = vweird.f32 %v239_v44 }
 0x23e   :  { %v387_v45 = vpop.eup %386 }
 0x23f   :  { %v241_v46 = vmul.f32 %v387_v45, %v239_v44  ;;  %vm247_vm12 = vweird.f32 %v387_v45 }
 0x240   :  { %vm248_vm14 = vmor %vm246_vm13, %vm247_vm12 }
 0x241   :  { %v242_v47 = vmul.f32 %v387_v45, %v241_v46 }
 0x243   :  { %v243_v48 = vmul.f32 0.5, %v242_v47 }
 0x245   :  { %v244_v49 = vsub.f32 1.5, %v243_v48 }
 0x247   :  { %v245_v50 = vmul.f32 %v387_v45, %v244_v49 }
 0x249   :  { %v249_v51 = vsel %vm248_vm14, %v387_v45, %v245_v50 }
 0x24a   :  { %v250_v52 = vmul.f32 %v249_v51, %v477_v36 }
 0x24c   :  { %v251_v53 = vperm.slane %v250_v52, 4 }
 0x24e   :  { %v252_v55 = vmul.f32 %v251_v53, %v229_v29 }
 0x250   :  { %v254_v56 = vadd.f32 %v253_v54, %v252_v55 }
 0x252   :  { %vm255_vm15 = vcmp.gt.f32.partialorder %v254_v56, 0.0  ;;  %v256_v57 = vmul.f32 0.01, %v254_v56 }
 0x254   :  { %v257_v58 = vsel %vm255_vm15, %v254_v56, %v256_v57 }
 0x255   :  { %375 = vmatmul.msk.f32.vlgmr.msrb.gmra.mxu0 %vm92_vm3, %v257_v58 }
 0x2d2   :  { %v282_v59 = vpop.f32.mrf.mxu0 }
 0x2d3   :  { %v285_v60 = vsel %vm92_vm3, %v282_v59, 0.0 }
 0x2d4   :  { %v286_v61 = vrot.slane %v285_v60, 4 }
 0x2d6   :  { %v287_v62 = vadd.f32 %v286_v61, %v285_v60 }
 0x2d8   :  { %v288_v63 = vrot.slane %v287_v62, 2 }
 0x2da   :  { %v289_v0 = vadd.f32 %v288_v63, %v287_v62 }
 0x2dc   :  { %v290_v1 = vrot.slane %v289_v0, 1 }
 0x2de   :  { %v291_v2 = vadd.f32 %v290_v1, %v289_v0 }
 0x2e0   :  { %v292_v3 = vmul.f32 0.125, %v291_v2 }
 0x2e2   :  { %v293_v4 = vsub.f32 %v282_v59, %v292_v3 }
 0x2e4   :  { %v294_v5 = vmul.f32 %v293_v4, %v293_v4 }
 0x2e6   :  { %v295_v6 = vsel %vm92_vm3, %v294_v5, 0.0 }
 0x2e7   :  { %v296_v7 = vrot.slane %v295_v6, 4 }
 0x2e9   :  { %v297_v8 = vadd.f32 %v296_v7, %v295_v6 }
 0x2eb   :  { %v298_v9 = vrot.slane %v297_v8, 2 }
 0x2ed   :  { %v299_v11 = vadd.f32 %v298_v9, %v297_v8 }
 0x2ef   :  { %v300_v13 = vrot.slane %v299_v11, 1 }
 0x2f1   :  { %v301_v16 = vadd.f32 %v300_v13, %v299_v11 }
 0x2f3   :  { %v302_v17 = vmul.f32 0.125, %v301_v16 }
 0x2f5   :  { %v303_v18 = vadd.f32 1e-05, %v302_v17 }
 0x2f7   :  { %388 = vrsqrt.f32 %v303_v18  ;;  %vm310_vm1 = vweird.f32 %v303_v18 }
 0x2fd   :  { %v389_v19 = vpop.eup %388 }
 0x2fe   :  { %v305_v20 = vmul.f32 %v389_v19, %v303_v18  ;;  %vm311_vm0 = vweird.f32 %v389_v19 }
 0x2ff   :  { %vm312_vm2 = vmor %vm310_vm1, %vm311_vm0 }
 0x300   :  { %v306_v21 = vmul.f32 %v389_v19, %v305_v20 }
 0x302   :  { %v307_v22 = vmul.f32 0.5, %v306_v21 }
 0x304   :  { %v308_v23 = vsub.f32 1.5, %v307_v22 }
 0x306   :  { %v309_v24 = vmul.f32 %v389_v19, %v308_v23 }
 0x308   :  { %v313_v25 = vsel %vm312_vm2, %v389_v19, %v309_v24 }
 0x309   :  { %v314_v26 = vmul.f32 %v313_v25, %v477_v36 }
 0x30b   :  { %v315_v27 = vperm.slane %v314_v26, 6 }
 0x30d   :  { %v316_v29 = vmul.f32 %v315_v27, %v293_v4 }
 0x30f   :  { %v318_v30 = vadd.f32 %v317_v28, %v316_v29 }
 0x311   :  { %vm319_vm4 = vcmp.gt.f32.partialorder %v318_v30, 0.0  ;;  %v320_v31 = vmul.f32 0.01, %v318_v30 }
 0x313   :  { %v321_v32 = vsel %vm319_vm4, %v318_v30, %v320_v31 }
 0x314   :  { %376 = vmatmul.msk.f32.vlgmr.msrb.gmra.mxu1 %vm92_vm3, %v321_v32 }
 0x391   :  { %v348_v34 = vpop.f32.mrf.mxu1 }
 0x392   :  { %v349_v35 = vadd.f32 %v381_v33, %v348_v34 }
 0x394   :  { %351 = vst [vmem:[#allocation5] sm:$0xff] %v349_v35 }
 0x395   :  { %362 = dma.vmem_to_hbm [thread:$0]  %s358_s1, 128, %s360_s24, [#allocation4]  }
 0x396   :  { %440 = dma.done.wait [#allocation4], 128  }
 0x397   :  { %441 = vsyncadd [#allocation4], 4294967168 }
 0x398   :  { %367 = vsyncpa [#allocation3], 1 }
 0x399   :  { %368 = vsyncpa [#allocation4], 1 }

</bundles_post_ra>
